<compile_context>
chip_gen: v6e
topology: v6e:2x2x1
jax: 0.10.0
libtpu: 0.0.40
codegen_flags: <defaults>
</compile_context>

<pallas_src>
import functools

import numpy as np
import jax
import jax.numpy as jnp
from jax import lax
from jax.experimental import pallas as pl
from jax.experimental.pallas import tpu as pltpu

F32_TINY = float(np.finfo(np.float32).tiny)
LANE = 128
SUBLANE = 8
NCORES = 2   # leading "parallel" grid axis -> 2-TC split on v7x; harmless on v5e/v6e


# --------------------------------------------------------------------------
# Kernel: focal-loss partial sums (positive loss, negative loss, #positives)
# --------------------------------------------------------------------------
def _focal_sums_kernel(pred_ref, tgt_ref, out_ref, *, n_elems, tile_rows, steps_per_core):
    """Per-tile focal-loss terms accumulated into a lane-dense per-core output slab.

    out_ref block (1, 24, 128) f32:
      sublanes  0: 7  running positive-loss partial sums
      sublanes  8:15  running negative-loss partial sums
      sublanes 16:23  running positive-count partial sums
    """
    c = pl.program_id(0)          # core / parallel slice
    i = pl.program_id(1)          # reduction step within this core

    @pl.when(i == 0)
    def _init():
        out_ref[...] = jnp.zeros_like(out_ref)

    # Logical element index of every slot of this tile in the flattened heatmap.  Tiles whose
    # logical block index overshoots the real block count are fully masked here.
    blk = c * steps_per_core + i
    row0 = blk * tile_rows
    rid = lax.broadcasted_iota(jnp.int32, (tile_rows, LANE), 0) + row0
    lid = lax.broadcasted_iota(jnp.int32, (tile_rows, LANE), 1)
    in_bounds = (rid * LANE + lid) < n_elems

    tgt = tgt_ref[...].astype(jnp.float32)
    p = jnp.maximum(pred_ref[...].astype(jnp.float32), F32_TINY)   # torch.clamp(pred, tiny)
    is_pos = tgt == 1.0                                            # target.eq(1)
    is_neg = tgt < 1.0                                             # target.lt(1)

    # One log per element: positives use log(p), negatives use log(1 - p + tiny).
    lg = jnp.log(jnp.where(is_pos, p, 1.0 - p + F32_TINY))
    zero = jnp.zeros_like(p)
    pos_loss = jnp.where(is_pos & in_bounds, lg * (1.0 - p) ** 2, zero)
    neg_loss = jnp.where(is_neg & in_bounds, lg * (p * p) * (1.0 - tgt) ** 4, zero)
    pos_cnt = jnp.where(is_pos & in_bounds, jnp.ones_like(p), zero)

    # Reduce only along the sublane-block axis (VPU adds); the full cross-lane reduce to a
    # scalar happens once in the wrapper.  (tile_rows, 128) -> (tile_rows//8, 8, 128) keeps
    # the native (8, 128) tiling, so the reshape is layout-free.
    pos_p = pos_loss.reshape(-1, SUBLANE, LANE).sum(axis=0)
    neg_p = neg_loss.reshape(-1, SUBLANE, LANE).sum(axis=0)
    cnt_p = pos_cnt.reshape(-1, SUBLANE, LANE).sum(axis=0)

    out_ref[0, 0:8, :] = out_ref[0, 0:8, :] + pos_p
    out_ref[0, 8:16, :] = out_ref[0, 8:16, :] + neg_p
    out_ref[0, 16:24, :] = out_ref[0, 16:24, :] + cnt_p


def focal_loss_pallas(pred_hm, tgt_hm, tile_rows=1024):
    n = int(np.prod(pred_hm.shape))
    pred_flat = pred_hm.reshape(-1)     # dtype preserved; upcast happens inside the kernel
    tgt_flat = tgt_hm.reshape(-1)

    vreg = SUBLANE * LANE
    if n % vreg != 0:
        # Only the misaligned case pays a pad copy; aligned NCHW heatmaps reshape for free.
        pad = (-n) % vreg
        pred_flat = jnp.pad(pred_flat, (0, pad))
        tgt_flat = jnp.pad(tgt_flat, (0, pad))
    rows = pred_flat.shape[0] // LANE
    pred2d = pred_flat.reshape(rows, LANE)
    tgt2d = tgt_flat.reshape(rows, LANE)

    tile_rows = max(SUBLANE, min(int(tile_rows), rows))
    tile_rows -= tile_rows % SUBLANE
    steps = pl.cdiv(rows, tile_rows)
    ncores = min(NCORES, steps)
    spc = pl.cdiv(steps, ncores)         # reduction steps per core
    last_block = steps - 1

    def in_map(c, i):
        # Clamp so the DMA never walks past the array; overshot tiles are masked in-kernel.
        return (jnp.minimum(c * spc + i, last_block), 0)

    kernel = functools.partial(_focal_sums_kernel, n_elems=n,
                               tile_rows=tile_rows, steps_per_core=spc)

    out = pl.pallas_call(
        kernel,
        out_shape=jax.ShapeDtypeStruct((ncores, 3 * SUBLANE, LANE), jnp.float32),
        grid_spec=pltpu.PrefetchScalarGridSpec(
            num_scalar_prefetch=0,
            grid=(ncores, spc),
            in_specs=[pl.BlockSpec((tile_rows, LANE), in_map),
                      pl.BlockSpec((tile_rows, LANE), in_map)],
            out_specs=pl.BlockSpec((1, 3 * SUBLANE, LANE), lambda c, i: (c, 0, 0))),
        compiler_params=pltpu.CompilerParams(
            dimension_semantics=("parallel", "arbitrary")),
    )(pred2d, tgt2d)

    sums = out.reshape(ncores, 3, SUBLANE, LANE).sum(axis=(0, 2, 3))
    pos, neg, npos = sums[0], sums[1], sums[2]
    # if num_positive == 0: loss = -neg  else: -(pos + neg) / num_positive
    return jnp.where(npos == 0.0, -neg, -(pos + neg) / jnp.maximum(npos, 1.0))


# --------------------------------------------------------------------------
# Box-regression loss: plain JAX (only B*2*Nmax values -> not worth a pallas_call)
# --------------------------------------------------------------------------
def _box_regression_sum(pred_reg, bboxes, labels, centers, smooth):
    """Sum-reduced (smooth-)L1 between pred_reg gathered at box centers and the box (w, h).

    Matches the PyTorch module: pred[2][b, :, y, x] keeps the channel dim in front, so
    channel 0 pairs with widths and channel 1 with heights.  Valid boxes are assumed to be a
    prefix (labels == -1 padding at the end), mirroring infos[b]['bbox_centers'] which holds
    only the real centers.
    """
    B, C2, H, W = pred_reg.shape
    valid = (labels > -1).astype(jnp.float32)                       # (B, N)
    # Keep gather indices in-range even for padded entries (they are masked afterwards).
    cx = jnp.clip(centers[..., 0].astype(jnp.int32), 0, W - 1)
    cy = jnp.clip(centers[..., 1].astype(jnp.int32), 0, H - 1)
    bidx = jnp.arange(B)[:, None, None]
    cidx = jnp.arange(C2)[None, :, None]
    gathered = pred_reg[bidx, cidx, cy[:, None, :], cx[:, None, :]]  # (B, 2, N)

    w = bboxes[..., 2] - bboxes[..., 0]
    h = bboxes[..., 3] - bboxes[..., 1]
    wh = jnp.stack([w, h], axis=1)                                   # (B, 2, N)

    d = gathered.astype(jnp.float32) - wh.astype(jnp.float32)
    ad = jnp.abs(d)
    per = jnp.where(ad < 1.0, 0.5 * d * d, ad - 0.5) if smooth else ad
    reg_sum = jnp.sum(per * valid[:, None, :])
    num = jnp.sum(valid)
    return reg_sum, num


# --------------------------------------------------------------------------
# Forward (equivalent of LocalizationCriterion.forward)
# --------------------------------------------------------------------------
def localization_criterion(pred_hm, pred_reg, bboxes, labels, heatmaps, centers,
                           alpha=2, gamma=4, box_loss='l1_loss', eps=1e-7,
                           tile_rows=1024):
    """
    pred_hm  : (B, C, H, W)   == pred[1]   heatmap / centerness prediction
    pred_reg : (B, 2, H, W)   == pred[2]   wh regression prediction
    bboxes   : (B, Nmax, 4)   (x1, y1, x2, y2), padded
    labels   : (B, Nmax)      class ids, -1 for padding (labels.gt(-1) mask)
    heatmaps : (B, C, H, W)   target heatmaps
    centers  : (B, Nmax, 2)   int (x, y) box centers == infos[b]['bbox_centers']
    """
    assert box_loss in ('l1_loss', 'smooth_l1_loss')
    del alpha, gamma  # the reference _focal_loss hardcodes exponents 2 and 4

    centerness_loss = focal_loss_pallas(pred_hm, heatmaps, tile_rows=tile_rows)
    reg_sum, num = _box_regression_sum(
        pred_reg, bboxes, labels, centers, smooth=(box_loss == 'smooth_l1_loss'))
    bbox_loss = reg_sum / (num + eps) * 0.1
    total = centerness_loss + bbox_loss
    return total, (centerness_loss, bbox_loss)


# --------------------------------------------------------------------------
# Pure-JAX reference mirroring the PyTorch code, for validation
# --------------------------------------------------------------------------
def _reference(pred_hm, pred_reg, bboxes, labels, heatmaps, centers, eps=1e-7):
    tgt = heatmaps
    p = jnp.maximum(pred_hm, F32_TINY)
    pos = (tgt == 1.0).astype(jnp.float32)
    neg = (tgt < 1.0).astype(jnp.float32)
    nw = (1.0 - tgt) ** 4
    pos_l = (jnp.log(p) * (1.0 - p) ** 2 * pos).sum()
    neg_l = (jnp.log(1.0 - p + F32_TINY) * p * p * nw * neg).sum()
    npos = pos.sum()
    cl = jnp.where(npos == 0, -neg_l, -(pos_l + neg_l) / jnp.maximum(npos, 1.0))

    valid = np.asarray(labels > -1)
    reg = jnp.float32(0.0)
    num = 0
    for b in range(pred_reg.shape[0]):
        nb = int(valid[b].sum())
        ct = centers[b, :nb]
        # PyTorch: pred[2][b, :, y, x] keeps the channel dim FIRST (the python-int batch index
        # is a basic select in torch).  Replicate with two-step indexing; a fused NumPy/JAX
        # expression would move the advanced dims to the front and scramble the pairing.
        g = pred_reg[b][:, ct[:, 1], ct[:, 0]].reshape(-1)           # (2*nb,) channel-major
        bb = bboxes[b, :nb]
        wh = jnp.stack([bb[:, 2] - bb[:, 0], bb[:, 3] - bb[:, 1]]).reshape(-1)
        reg = reg + jnp.abs(g - wh).sum()
        num += nb
    bl = reg / (num + eps) * 0.1
    return cl + bl, cl, bl


if __name__ == "__main__":
    key = jax.random.PRNGKey(0)
    B, C, H, W = 2, 4, 16, 16
    Nmax = 8
    ks = jax.random.split(key, 10)

    pred_hm = jax.nn.sigmoid(jax.random.normal(ks[0], (B, C, H, W), jnp.float32))
    pred_reg = jax.random.normal(ks[1], (B, 2, H, W), jnp.float32) * 4.0

    # target heatmaps in [0, 0.9) with exact 1.0 planted at valid box centers
    heatmaps = jax.random.uniform(ks[2], (B, C, H, W), jnp.float32, 0.0, 0.9)
    cx = jax.random.randint(ks[3], (B, Nmax), 0, W)
    cy = jax.random.randint(ks[4], (B, Nmax), 0, H)
    cls = jax.random.randint(ks[5], (B, Nmax), 0, C)
    n_valid = jnp.array([5, 7], jnp.int32)
    labels = jnp.where(jnp.arange(Nmax)[None, :] < n_valid[:, None], cls, -1)
    valid = labels > -1
    bidx = jnp.arange(B)[:, None]
    upd = jnp.where(valid, 1.0, heatmaps[bidx, cls, cy, cx])
    heatmaps = heatmaps.at[bidx, cls, cy, cx].set(upd)

    x1 = jax.random.uniform(ks[6], (B, Nmax), jnp.float32, 0.0, W / 2)
    y1 = jax.random.uniform(ks[7], (B, Nmax), jnp.float32, 0.0, H / 2)
    wb = jax.random.uniform(ks[8], (B, Nmax), jnp.float32, 1.0, W / 2)
    hb = jax.random.uniform(ks[9], (B, Nmax), jnp.float32, 1.0, H / 2)
    bboxes = jnp.stack([x1, y1, x1 + wb, y1 + hb], axis=-1)              # (B, Nmax, 4)
    centers = jnp.stack([cx, cy], axis=-1).astype(jnp.int32)             # (B, Nmax, 2)

    total, (c_loss, b_loss) = localization_criterion(
        pred_hm, pred_reg, bboxes, labels, heatmaps, centers)
    total = jax.block_until_ready(total)

    ref_total, ref_c, ref_b = _reference(
        pred_hm, pred_reg, bboxes, labels, heatmaps, centers)

    np.testing.assert_allclose(np.array(c_loss), np.array(ref_c), rtol=1e-4, atol=1e-4)
    np.testing.assert_allclose(np.array(b_loss), np.array(ref_b), rtol=1e-4, atol=1e-4)
    np.testing.assert_allclose(np.array(total), np.array(ref_total), rtol=1e-4, atol=1e-4)

    print("KERNEL_OK")
</pallas_src>

<mosaic_0001>
module attributes {stable_mosaic.version = 11 : i64} {
  func.func @_focal_sums_kernel(%arg0: i32, %arg1: i32, %arg2: memref<16x128xf32, #tpu.memory_space<vmem>>, %arg3: memref<16x128xf32, #tpu.memory_space<vmem>>, %arg4: memref<1x24x128xf32, #tpu.memory_space<vmem>>) attributes {dimension_semantics = [#tpu.dimension_semantics<parallel>, #tpu.dimension_semantics<arbitrary>], iteration_bounds = array<i64: 1, 1>, scalar_prefetch = 0 : i64, scratch_operands = 0 : i64, tpu.core_type = #tpu.core_type<tc>, window_params = [{transform_indices = @transform_0, window_bounds = array<i64: 16, 128>}, {transform_indices = @transform_1, window_bounds = array<i64: 16, 128>}, {transform_indices = @transform_2, window_bounds = array<i64: 1, 24, 128>}]} {
    %c0_i32 = arith.constant 0 : i32
    %0 = arith.cmpi eq, %arg1, %c0_i32 : i32
    %1 = arith.extui %0 : i1 to i32
    %c0_i32_0 = arith.constant 0 : i32
    %2 = arith.cmpi ne, %1, %c0_i32_0 : i32
    scf.if %2 {
      %cst_31 = arith.constant 0.000000e+00 : f32
      %72 = vector.broadcast %cst_31 : f32 to vector<1x24x128xf32>
      %c0_32 = arith.constant 0 : index
      %c0_33 = arith.constant 0 : index
      %c0_34 = arith.constant 0 : index
      %73 = vector.load %arg4[%c0_32, %c0_33, %c0_34] : memref<1x24x128xf32, #tpu.memory_space<vmem>>, vector<1x24x128xf32>
      tpu.vector_store %arg4[%c0_32, %c0_33, %c0_34], %72 {strides = array<i32>} : memref<1x24x128xf32, #tpu.memory_space<vmem>>, vector<1x24x128xf32>,
    } else {
    }
    %c1_i32 = arith.constant 1 : i32
    %3 = arith.muli %arg0, %c1_i32 : i32
    %4 = arith.addi %3, %arg1 : i32
    %c16_i32 = arith.constant 16 : i32
    %5 = arith.muli %4, %c16_i32 : i32
    %6 = tpu.iota {dimensions = array<i32: 0>} : vector<16x128xi32>
    %7 = vector.broadcast %5 : i32 to vector<16x128xi32>
    %8 = arith.addi %6, %7 : vector<16x128xi32>
    %9 = tpu.iota {dimensions = array<i32: 1>} : vector<16x128xi32>
    %c128_i32 = arith.constant 128 : i32
    %10 = vector.broadcast %c128_i32 : i32 to vector<16x128xi32>
    %11 = arith.muli %8, %10 : vector<16x128xi32>
    %12 = arith.addi %11, %9 : vector<16x128xi32>
    %c2048_i32 = arith.constant 2048 : i32
    %13 = vector.broadcast %c2048_i32 : i32 to vector<16x128xi32>
    %14 = arith.cmpi slt, %12, %13 : vector<16x128xi32>
    %c0 = arith.constant 0 : index
    %c0_1 = arith.constant 0 : index
    %15 = vector.load %arg3[%c0, %c0_1] : memref<16x128xf32, #tpu.memory_space<vmem>>, vector<16x128xf32>
    %c0_2 = arith.constant 0 : index
    %c0_3 = arith.constant 0 : index
    %16 = vector.load %arg2[%c0_2, %c0_3] : memref<16x128xf32, #tpu.memory_space<vmem>>, vector<16x128xf32>
    %cst = arith.constant 1.17549435E-38 : f32
    %17 = vector.broadcast %cst : f32 to vector<16x128xf32>
    %18 = arith.maximumf %16, %17 : vector<16x128xf32>
    %cst_4 = arith.constant 1.000000e+00 : f32
    %19 = vector.broadcast %cst_4 : f32 to vector<16x128xf32>
    %20 = arith.cmpf oeq, %15, %19 : vector<16x128xf32>
    %cst_5 = arith.constant 1.000000e+00 : f32
    %21 = vector.broadcast %cst_5 : f32 to vector<16x128xf32>
    %22 = arith.cmpf olt, %15, %21 : vector<16x128xf32>
    %cst_6 = arith.constant 1.000000e+00 : f32
    %23 = vector.broadcast %cst_6 : f32 to vector<16x128xf32>
    %24 = arith.subf %23, %18 : vector<16x128xf32>
    %cst_7 = arith.constant 1.17549435E-38 : f32
    %25 = vector.broadcast %cst_7 : f32 to vector<16x128xf32>
    %26 = arith.addf %24, %25 : vector<16x128xf32>
    %27 = arith.select %20, %18, %26 : vector<16x128xi1>, vector<16x128xf32>
    %28 = math.log %27 : vector<16x128xf32>
    %cst_8 = arith.constant 0.000000e+00 : f32
    %29 = vector.broadcast %cst_8 : f32 to vector<16x128xf32>
    %30 = arith.andi %20, %14 : vector<16x128xi1>
    %cst_9 = arith.constant 1.000000e+00 : f32
    %31 = vector.broadcast %cst_9 : f32 to vector<16x128xf32>
    %32 = arith.subf %31, %18 : vector<16x128xf32>
    %33 = arith.mulf %32, %32 : vector<16x128xf32>
    %34 = arith.mulf %28, %33 : vector<16x128xf32>
    %35 = arith.select %30, %34, %29 : vector<16x128xi1>, vector<16x128xf32>
    %36 = arith.andi %22, %14 : vector<16x128xi1>
    %37 = arith.mulf %18, %18 : vector<16x128xf32>
    %38 = arith.mulf %28, %37 : vector<16x128xf32>
    %cst_10 = arith.constant 1.000000e+00 : f32
    %39 = vector.broadcast %cst_10 : f32 to vector<16x128xf32>
    %40 = arith.subf %39, %15 : vector<16x128xf32>
    %41 = arith.mulf %40, %40 : vector<16x128xf32>
    %42 = arith.mulf %41, %41 : vector<16x128xf32>
    %43 = arith.mulf %38, %42 : vector<16x128xf32>
    %44 = arith.select %36, %43, %29 : vector<16x128xi1>, vector<16x128xf32>
    %45 = arith.andi %20, %14 : vector<16x128xi1>
    %cst_11 = arith.constant 1.000000e+00 : f32
    %46 = vector.broadcast %cst_11 : f32 to vector<16x128xf32>
    %47 = arith.select %45, %46, %29 : vector<16x128xi1>, vector<16x128xf32>
    %48 = vector.shape_cast %35 : vector<16x128xf32> to vector<2x8x128xf32>
    %cst_12 = arith.constant dense<0.000000e+00> : vector<8x128xf32>
    %49 = vector.multi_reduction <add>, %48, %cst_12 [0] : vector<2x8x128xf32> to vector<8x128xf32>
    %50 = vector.shape_cast %44 : vector<16x128xf32> to vector<2x8x128xf32>
    %cst_13 = arith.constant dense<0.000000e+00> : vector<8x128xf32>
    %51 = vector.multi_reduction <add>, %50, %cst_13 [0] : vector<2x8x128xf32> to vector<8x128xf32>
    %52 = vector.shape_cast %47 : vector<16x128xf32> to vector<2x8x128xf32>
    %cst_14 = arith.constant dense<0.000000e+00> : vector<8x128xf32>
    %53 = vector.multi_reduction <add>, %52, %cst_14 [0] : vector<2x8x128xf32> to vector<8x128xf32>
    %c0_15 = arith.constant 0 : index
    %c0_16 = arith.constant 0 : index
    %c0_17 = arith.constant 0 : index
    %54 = vector.load %arg4[%c0_15, %c0_16, %c0_17] : memref<1x24x128xf32, #tpu.memory_space<vmem>>, vector<1x8x128xf32>
    %55 = vector.shape_cast %54 : vector<1x8x128xf32> to vector<8x128xf32>
    %56 = arith.addf %55, %49 : vector<8x128xf32>
    %c0_18 = arith.constant 0 : index
    %c0_19 = arith.constant 0 : index
    %c0_20 = arith.constant 0 : index
    %57 = vector.load %arg4[%c0_18, %c0_19, %c0_20] : memref<1x24x128xf32, #tpu.memory_space<vmem>>, vector<1x8x128xf32>
    %58 = vector.shape_cast %57 : vector<1x8x128xf32> to vector<8x128xf32>
    %59 = vector.shape_cast %56 : vector<8x128xf32> to vector<1x8x128xf32>
    tpu.vector_store %arg4[%c0_18, %c0_19, %c0_20], %59 {strides = array<i32>} : memref<1x24x128xf32, #tpu.memory_space<vmem>>, vector<1x8x128xf32>,
    %c0_21 = arith.constant 0 : index
    %c8 = arith.constant 8 : index
    %c0_22 = arith.constant 0 : index
    %60 = vector.load %arg4[%c0_21, %c8, %c0_22] : memref<1x24x128xf32, #tpu.memory_space<vmem>>, vector<1x8x128xf32>
    %61 = vector.shape_cast %60 : vector<1x8x128xf32> to vector<8x128xf32>
    %62 = arith.addf %61, %51 : vector<8x128xf32>
    %c0_23 = arith.constant 0 : index
    %c8_24 = arith.constant 8 : index
    %c0_25 = arith.constant 0 : index
    %63 = vector.load %arg4[%c0_23, %c8_24, %c0_25] : memref<1x24x128xf32, #tpu.memory_space<vmem>>, vector<1x8x128xf32>
    %64 = vector.shape_cast %63 : vector<1x8x128xf32> to vector<8x128xf32>
    %65 = vector.shape_cast %62 : vector<8x128xf32> to vector<1x8x128xf32>
    tpu.vector_store %arg4[%c0_23, %c8_24, %c0_25], %65 {strides = array<i32>} : memref<1x24x128xf32, #tpu.memory_space<vmem>>, vector<1x8x128xf32>,
    %c0_26 = arith.constant 0 : index
    %c16 = arith.constant 16 : index
    %c0_27 = arith.constant 0 : index
    %66 = vector.load %arg4[%c0_26, %c16, %c0_27] : memref<1x24x128xf32, #tpu.memory_space<vmem>>, vector<1x8x128xf32>
    %67 = vector.shape_cast %66 : vector<1x8x128xf32> to vector<8x128xf32>
    %68 = arith.addf %67, %53 : vector<8x128xf32>
    %c0_28 = arith.constant 0 : index
    %c16_29 = arith.constant 16 : index
    %c0_30 = arith.constant 0 : index
    %69 = vector.load %arg4[%c0_28, %c16_29, %c0_30] : memref<1x24x128xf32, #tpu.memory_space<vmem>>, vector<1x8x128xf32>
    %70 = vector.shape_cast %69 : vector<1x8x128xf32> to vector<8x128xf32>
    %71 = vector.shape_cast %68 : vector<8x128xf32> to vector<1x8x128xf32>
    tpu.vector_store %arg4[%c0_28, %c16_29, %c0_30], %71 {strides = array<i32>} : memref<1x24x128xf32, #tpu.memory_space<vmem>>, vector<1x8x128xf32>,
    return
  }
  func.func @transform_0(%arg0: i32, %arg1: i32) -> (i32, i32) {
    %c1_i32 = arith.constant 1 : i32
    %0 = arith.muli %arg0, %c1_i32 : i32
    %1 = arith.addi %0, %arg1 : i32
    %c0_i32 = arith.constant 0 : i32
    %2 = arith.minsi %1, %c0_i32 : i32
    %c0_i32_0 = arith.constant 0 : i32
    %c0_i32_1 = arith.constant 0 : i32
    return %2, %c0_i32_0 : i32, i32
  }
  func.func @transform_1(%arg0: i32, %arg1: i32) -> (i32, i32) {
    %c1_i32 = arith.constant 1 : i32
    %0 = arith.muli %arg0, %c1_i32 : i32
    %1 = arith.addi %0, %arg1 : i32
    %c0_i32 = arith.constant 0 : i32
    %2 = arith.minsi %1, %c0_i32 : i32
    %c0_i32_0 = arith.constant 0 : i32
    %c0_i32_1 = arith.constant 0 : i32
    return %2, %c0_i32_0 : i32, i32
  }
  func.func @transform_2(%arg0: i32, %arg1: i32) -> (i32, i32, i32) {
    %c0_i32 = arith.constant 0 : i32
    %c0_i32_0 = arith.constant 0 : i32
    %c0_i32_1 = arith.constant 0 : i32
    return %arg0, %c0_i32, %c0_i32_0 : i32, i32, i32
  }
}

</mosaic_0001>

<bundles_post_ra>
// kernel: tpu_custom_call.1
= control target key start
LH: loop header
LB: loop body
LE: loop exit
PB: predicated region body
PF: predicated region fallthrough
CT: control target
= control target key end

     0   :  { %7 = vsyncpa [#allocation3], 0  ;;  %s298_s0 = inlined_call_operand.hbm [shape: f32[16,128], index: 0, kind: input, shape index: {}]   ;;  %s299_s1 = inlined_call_operand.hbm [shape: f32[16,128], index: 1, kind: input, shape index: {}]   ;;  %s300_s2 = inlined_call_operand.hbm [shape: f32[1,24,128], index: 2, kind: output, shape index: {}]  }
   0x1   :  { %8 = vsyncpa [#allocation6], 0 }
   0x2   :  { %9 = vsyncpa [#allocation4], 0  ;;  %s239_s9 = smov [#allocation2]  }
   0x3   :  { %s21_s10 = sshll.u32 %s239_s9, 4  ;;  %s22_s10 = int_to_ptr.vmem [resolvable:$true] %s21_s10 }
   0x4   :  { %s181_s11 = scalar_lea.vmem %s22_s10, 256  ;;  %p186_p1 = scmp.lt.s32.totalorder %s22_s10, %s22_s10 }
   0x5   :  { %p182_p0 = scmp.ne.s32.totalorder %s22_s10, %s181_s11  ;;  %p187_p2 = scmp.lt.s32.totalorder %s181_s11, %s181_s11 }
   0x7   :  { %p188_p3 = por %p187_p2, %p186_p1 }
   0x9   :  { %p189_p4 = pnand %p188_p3, %p182_p0 }
   0xb   :  { %192 = shalt.err (!%p189_p4)
}
   0xc   :  { %s240_s12 = smov 128   ;;  %s241_s13 = smov 8  }
   0xd   :  { %27 = dma.hbm_to_vmem [thread:$0]  %s298_s0, 256, %s22_s10, [#allocation3], %s240_s12, %s240_s12, %s241_s13  }
   0xe   :  { %s242_s16 = smov [#allocation5]  }
   0xf   :  { %s39_s17 = sshll.u32 %s242_s16, 4  ;;  %s40_s17 = int_to_ptr.vmem [resolvable:$true] %s39_s17 }
  0x10   :  { %s201_s18 = scalar_lea.vmem %s40_s17, 256  ;;  %p206_p6 = scmp.lt.s32.totalorder %s40_s17, %s40_s17 }
  0x11   :  { %p202_p5 = scmp.ne.s32.totalorder %s40_s17, %s201_s18  ;;  %p207_p7 = scmp.lt.s32.totalorder %s201_s18, %s201_s18 }
  0x13   :  { %p208_p8 = por %p207_p7, %p206_p6 }
  0x15   :  { %p209_p9 = pnand %p208_p8, %p202_p5 }
  0x17   :  { %212 = shalt.err (!%p209_p9)
}
  0x18   :  { %45 = dma.hbm_to_vmem [thread:$0]  %s299_s1, 256, %s40_s17, [#allocation6], %s240_s12, %s240_s12, %s241_s13  }
  0x19   :  { %233 = dma.done.wait [#allocation3], 256  }
  0x1a   :  { %234 = vsyncadd [#allocation3], 4294967040 }
  0x1b   :  { %235 = dma.done.wait [#allocation6], 256  }
  0x1c   :  { %236 = vsyncadd [#allocation6], 4294967040  ;;  %v69_v0 = vlaneseq  ;;  %v83_v7 = vld [vmem:[#allocation5] sm:$0xff]  ;;  %v84_v8 = vld [vmem:[#allocation5 + $0x8] sm:$0xff]  ;;  %v243_v18 = vmov 0.0   ;;  %s244_s0 = smov [#allocation7]  }
  0x1d   :  { %v85_v9 = vld [vmem:[#allocation2] sm:$0xff]  ;;  %v86_v11 = vld [vmem:[#allocation2 + $0x8] sm:$0xff]  ;;  %vm89_vm1 = vcmp.eq.f32.partialorder %v83_v7, 1.0  ;;  %vm90_vm4 = vcmp.eq.f32.partialorder %v84_v8, 1.0  ;;  %v117_v26 = vsub.f32 1.0, %v83_v7  ;;  %v118_v27 = vsub.f32 1.0, %v84_v8 }
  0x1e   :  { %v70_v1 = vshrl.u32 %v69_v0, 7  ;;  %v76_v2 = vand.u32 127, %v69_v0  ;;  %v87_v12 = vmax.f32 %v85_v9, 1.1754944e-38  ;;  %v88_v13 = vmax.f32 %v86_v11, 1.1754944e-38  ;;  %s146_s1 = sshll.u32 %s244_s0, 4  ;;  %s147_s1 = int_to_ptr.vmem [resolvable:$true] %s146_s1 }
  0x1f   :  { %v119_v28 = vmul.f32 %v117_v26, %v117_v26  ;;  %v120_v29 = vmul.f32 %v118_v27, %v118_v27  ;;  %vm91_vm6 = vcmp.lt.f32.partialorder %v83_v7, 1.0  ;;  %vm92_vm7 = vcmp.lt.f32.partialorder %v84_v8, 1.0  ;;  %s213_s21 = scalar_lea.vmem %s147_s1, 384  ;;  %p218_p11 = scmp.lt.s32.totalorder %s147_s1, %s147_s1 }
  0x20   :  { %v71_v3 = vadd.s32 8, %v70_v1  ;;  %v77_v4 = vmul.u32 128, %v70_v1  ;;  %v93_v15 = vsub.f32 1.0, %v87_v12  ;;  %v94_v16 = vsub.f32 1.0, %v88_v13  ;;  %p214_p10 = scmp.ne.s32.totalorder %s147_s1, %s213_s21  ;;  %p219_p12 = scmp.lt.s32.totalorder %s213_s21, %s213_s21 }
  0x21   :  { %v113_v31 = vmul.f32 %v87_v12, %v87_v12  ;;  %v114_v34 = vmul.f32 %v88_v13, %v88_v13  ;;  %v121_v37 = vmul.f32 %v119_v28, %v119_v28  ;;  %v122_v39 = vmul.f32 %v120_v29, %v120_v29 }
  0x22   :  { %v78_v5 = vmul.u32 128, %v71_v3  ;;  %v79_v6 = vadd.s32 %v77_v4, %v76_v2  ;;  %v95_v20 = vadd.f32 1.1754944e-38, %v93_v15  ;;  %v96_v22 = vadd.f32 1.1754944e-38, %v94_v16  ;;  %p220_p13 = por %p219_p12, %p218_p11 }
  0x23   :  { %v105_v30 = vmul.f32 %v93_v15, %v93_v15  ;;  %v106_v33 = vmul.f32 %v94_v16, %v94_v16 }
  0x24   :  { %v80_v10 = vadd.s32 %v78_v5, %v76_v2  ;;  %vm81_vm0 = vcmp.lt.s32.totalorder %v79_v6, 2048  ;;  %v97_v24 = vsel %vm89_vm1, %v87_v12, %v95_v20  ;;  %v98_v25 = vsel %vm90_vm4, %v88_v13, %v96_v22  ;;  %p221_p0 = pnand %p220_p13, %p214_p10 }
  0x25   :  { %vm273_vm2 = vmand %vm89_vm1, %vm81_vm0  ;;  %169 = vlog2.f32 %v97_v24 }
  0x26   :  { %vm82_vm3 = vcmp.lt.s32.totalorder %v80_v10, 2048  ;;  %v127_v19 = vsel %vm273_vm2, 1.0, %v243_v18  ;;  %171 = vlog2.f32 %v98_v25  ;;  %vm111_vm8 = vmand %vm91_vm6, %vm81_vm0 }
  0x27   :  { %vm278_vm5 = vmand %vm90_vm4, %vm82_vm3 }
  0x28   :  { %v128_v21 = vsel %vm278_vm5, 1.0, %v243_v18  ;;  %vm112_vm9 = vmand %vm92_vm7, %vm82_vm3 }
  0x29   :  { %v131_v23 = vadd.f32 %v128_v21, %v127_v19 }
  0x2b   :  { %140 = vst [vmem:[#allocation7 + $0x10] sm:$0xff] %v131_v23 }
  0x32   :  { %v170_v32 = vpop.eup %169 }
  0x33   :  { %v172_v35 = vpop.eup %171  ;;  %v100_v36 = vmul.f32 0.6931472, %v170_v32 }
  0x34   :  { %v102_v38 = vmul.f32 0.6931472, %v172_v35 }
  0x35   :  { %v107_v40 = vmul.f32 %v105_v30, %v100_v36  ;;  %v115_v41 = vmul.f32 %v113_v31, %v100_v36 }
  0x36   :  { %v108_v42 = vmul.f32 %v106_v33, %v102_v38  ;;  %v116_v43 = vmul.f32 %v114_v34, %v102_v38 }
  0x37   :  { %v109_v44 = vsel %vm273_vm2, %v107_v40, 0.0  ;;  %v123_v45 = vmul.f32 %v121_v37, %v115_v41 }
  0x38   :  { %v110_v46 = vsel %vm278_vm5, %v108_v42, 0.0  ;;  %v124_v47 = vmul.f32 %v122_v39, %v116_v43 }
  0x39   :  { %v129_v48 = vadd.f32 %v110_v46, %v109_v44  ;;  %v125_v49 = vsel %vm111_vm8, %v123_v45, 0.0 }
  0x3a   :  { %v126_v50 = vsel %vm112_vm9, %v124_v47, 0.0 }
  0x3b   :  { %v130_v51 = vadd.f32 %v126_v50, %v125_v49  ;;  %134 = vst [vmem:[#allocation7] sm:$0xff] %v129_v48 }
  0x3d   :  { %137 = vst [vmem:[#allocation7 + $0x8] sm:$0xff] %v130_v51 }
  0x3e   :  { %224 = shalt.err (!%p221_p0)
}
  0x3f   :  { %152 = dma.vmem_to_hbm [thread:$0]  %s147_s1, 384, %s300_s2, [#allocation4], %s240_s12, %s240_s12, %s241_s13  }
  0x40   :  { %237 = dma.done.wait [#allocation4], 384  }
  0x41   :  { %238 = vsyncadd [#allocation4], 4294966912 }
  0x42   :  { %156 = vsyncpa [#allocation3], 1 }
  0x43   :  { %157 = vsyncpa [#allocation6], 1 }
  0x44   :  { %158 = vsyncpa [#allocation4], 1 }

</bundles_post_ra>
